<compile_context>
chip_gen: v5e
topology: v5e:2x2
jax: 0.10.0
libtpu: 0.0.40
codegen_flags: <defaults>
</compile_context>

<pallas_src>
import math

import jax
import jax.numpy as jnp
from jax.experimental import pallas as pl
from jax.experimental.pallas import tpu as pltpu


def make_lsoftmax_kernel():
    def kernel(xT_ref, wT_ref, logit_t_ref, ls_t_ref, loss_ref, m_sc, l_sc):
        ci = pl.program_id(1)
        nc = pl.num_programs(1)

        @pl.when(ci == 0)
        def _init():
            m_sc[...] = jnp.full_like(m_sc, -jnp.inf)
            l_sc[...] = jnp.zeros_like(l_sc)

        # Raw logits for this class tile, transposed (TC, TB).
        # bf16 (or f32) inputs, f32 MXU accumulation.
        logit = jnp.dot(wT_ref[...], xT_ref[...],
                        preferred_element_type=jnp.float32)

        # Flash-style online logsumexp over the class axis; state is lane-dense
        # (1, TB) rows resident in VMEM scratch across class steps.
        tile_max = jnp.max(logit, axis=0, keepdims=True)
        m_new = jnp.maximum(m_sc[...], tile_max)
        alpha = jnp.exp(m_sc[...] - m_new)
        l_sc[...] = alpha * l_sc[...] + jnp.sum(jnp.exp(logit - m_new),
                                                axis=0, keepdims=True)
        m_sc[...] = m_new

        @pl.when(ci == nc - 1)
        def _finalize():
            m = m_sc[...]
            logit_t = logit_t_ref[...]          # (1, TB) f32, precomputed
            ls_t = ls_t_ref[...]                # (1, TB) f32, precomputed
            # Replace the raw target-logit contribution with the margin one.
            # ls_t <= logit_t <= m analytically, so exp() terms are <= ~1.
            p_t = jnp.exp(ls_t - m)
            l_corr = jnp.maximum(l_sc[...] - jnp.exp(logit_t - m), 0.0) + p_t
            lse = m + jnp.log(l_corr)
            loss_ref[...] = lse - ls_t          # per-sample CE loss

    return kernel


def lsoftmax_loss_pallas(x, weight, target, margin, *,
                         tb=128, tc=512, matmul_dtype=jnp.bfloat16):
    """x: (B, D), weight: (D, C), target: (B,) int. Returns scalar mean loss."""
    B, D = x.shape
    C = weight.shape[1]
    tb = min(tb, B)
    tc = min(tc, C)
    assert B % tb == 0, "batch must be divisible by the batch tile"
    assert C % tc == 0, "num classes must be divisible by the class tile"
    if tb < B:
        assert tb % 128 == 0, "batch tile must be lane-aligned (multiple of 128)"
    if tc < C:
        assert tc % 8 == 0, "class tile must be sublane-aligned (multiple of 8)"

    x = jnp.asarray(x, jnp.float32)
    weight = jnp.asarray(weight, jnp.float32)
    tgt = jnp.asarray(target, jnp.int32)

    # ---- Per-sample target quantities, computed once in f32 (O(B*D)) --------
    w_t = jnp.take(weight, tgt, axis=1)                    # (D, B) gathered cols
    logit_t = jnp.sum(x * w_t.T, axis=1)                   # (B,) target logits
    wsq_t = jnp.sum(w_t * w_t, axis=0)                     # (B,) ||W_target||^2
    xsq = jnp.sum(x * x, axis=1)                           # (B,) ||x||^2
    norm_prod = jnp.sqrt(wsq_t * xsq)
    cos_t = logit_t / (norm_prod + 1e-10)
    sin_sq = 1.0 - cos_t * cos_t

    # cos(m*theta) = sum_j (-1)^j C(m, 2j) cos^(m-2j) * sin^(2j)
    coeffs = [float(math.comb(margin, j)) for j in range(0, margin + 1, 2)]
    signs = [float((-1) ** j) for j in range(len(coeffs))]
    cos_exps = list(range(margin, -1, -2))
    cosm = jnp.zeros_like(cos_t)
    for j, (s, c, ce) in enumerate(zip(signs, coeffs, cos_exps)):
        cosm = cosm + (s * c) * (cos_t ** ce) * (sin_sq ** j)

    k = jnp.floor(jnp.arccos(jnp.clip(cos_t, -1.0, 1.0)) / (math.pi / margin))
    sign_k = 1.0 - 2.0 * jnp.mod(k, 2.0)                    # (-1)**k
    ls_t = norm_prod * (sign_k * cosm - 2.0 * k)            # (B,) f32

    logit_t = logit_t[None, :]                              # (1, B) lane-dense
    ls_t = ls_t[None, :]

    # ---- Matmul inputs: bf16 for the MXU (f32 accumulation in-kernel) -------
    xT = x.T.astype(matmul_dtype)                           # (D, B)
    wT = weight.T.astype(matmul_dtype)                      # (C, D)

    grid = (B // tb, C // tc)
    kernel = make_lsoftmax_kernel()

    per_sample = pl.pallas_call(
        kernel,
        out_shape=jax.ShapeDtypeStruct((1, B), jnp.float32),
        grid_spec=pltpu.PrefetchScalarGridSpec(
            num_scalar_prefetch=0,
            grid=grid,
            in_specs=[
                pl.BlockSpec((D, tb), lambda bi, ci: (0, bi)),   # x^T tile
                pl.BlockSpec((tc, D), lambda bi, ci: (ci, 0)),   # W^T tile
                pl.BlockSpec((1, tb), lambda bi, ci: (0, bi)),   # target logits
                pl.BlockSpec((1, tb), lambda bi, ci: (0, bi)),   # ls_target
            ],
            out_specs=pl.BlockSpec((1, tb), lambda bi, ci: (0, bi)),
            scratch_shapes=[
                pltpu.VMEM((1, tb), jnp.float32),   # running max
                pltpu.VMEM((1, tb), jnp.float32),   # running sum-exp
            ],
        ),
        compiler_params=pltpu.CompilerParams(
            dimension_semantics=("parallel", "arbitrary"),
            vmem_limit_bytes=32 * 1024 * 1024,
        ),
    )(xT, wT, logit_t, ls_t)

    return jnp.mean(per_sample)


def lsoftmax_loss_ref(x, weight, target, margin):
    """Pure-JAX f32 reference mirroring the PyTorch forward."""
    coeffs = [float(math.comb(margin, j)) for j in range(0, margin + 1, 2)]
    cos_exps = list(range(margin, -1, -2))
    sin_sq_exps = list(range(len(cos_exps)))
    signs = [float((-1) ** j) for j in range(len(cos_exps))]

    B = x.shape[0]
    logit = x @ weight
    logit_target = logit[jnp.arange(B), target]
    w_t_norm = jnp.linalg.norm(weight[:, target], axis=0)
    x_norm = jnp.linalg.norm(x, axis=1)
    norm_prod = w_t_norm * x_norm
    cos_t = logit_target / (norm_prod + 1e-10)
    sin_sq = 1.0 - cos_t ** 2
    cos_terms = jnp.stack([cos_t ** e for e in cos_exps], axis=1)
    sin_terms = jnp.stack([sin_sq ** e for e in sin_sq_exps], axis=1)
    cosm = jnp.sum(jnp.asarray(signs)[None, :] * jnp.asarray(coeffs)[None, :]
                   * cos_terms * sin_terms, axis=1)
    k = jnp.floor(jnp.arccos(jnp.clip(cos_t, -1.0, 1.0)) / (math.pi / margin))
    ls_target = norm_prod * (((-1.0) ** k) * cosm - 2.0 * k)
    logit = logit.at[jnp.arange(B), target].set(ls_target)
    logp = jax.nn.log_softmax(logit, axis=1)
    return -jnp.mean(logp[jnp.arange(B), target])


if __name__ == "__main__":
    # Module config (synthetic, deterministic).  Sized so the grid is actually
    # exercised: tb=128, tc=512 -> grid = (256/128, 1024/512) = (2, 2), and the
    # batch axis keeps >=2 "parallel" blocks for v7x's two TensorCores.
    input_dim = 64
    output_dim = 1024
    margin = 4
    batch = 256

    key = jax.random.PRNGKey(0)
    kx, kw, kt = jax.random.split(key, 3)

    x = jax.random.normal(kx, (batch, input_dim), dtype=jnp.float32)

    # kaiming_normal_ on weight.t() (shape (output_dim, input_dim)):
    # fan_in = input_dim, gain = sqrt(2) -> std = sqrt(2 / input_dim)
    std = math.sqrt(2.0 / input_dim)
    weight = std * jax.random.normal(kw, (input_dim, output_dim), dtype=jnp.float32)

    target = jax.random.randint(kt, (batch,), 0, output_dim, dtype=jnp.int32)

    ref = lsoftmax_loss_ref(x, weight, target, margin)

    # Default (bf16 MXU) path: logsumexp tolerates bf16 logits, the margin term
    # is f32 in the wrapper, so only a small tolerance loosening is needed.
    loss_bf16 = lsoftmax_loss_pallas(x, weight, target, margin)
    loss_bf16 = jax.block_until_ready(loss_bf16)
    assert jnp.isfinite(loss_bf16), loss_bf16
    assert jnp.allclose(loss_bf16, ref, rtol=5e-3, atol=5e-2), (loss_bf16, ref)

    # f32-matmul variant matches the f32 reference to tight tolerance.
    loss_f32 = lsoftmax_loss_pallas(x, weight, target, margin,
                                    matmul_dtype=jnp.float32)
    loss_f32 = jax.block_until_ready(loss_f32)
    assert jnp.isfinite(loss_f32), loss_f32
    assert jnp.allclose(loss_f32, ref, rtol=1e-4, atol=1e-3), (loss_f32, ref)

    print("KERNEL_OK")
</pallas_src>

<mosaic_0001>
module attributes {stable_mosaic.version = 11 : i64} {
  func.func @kernel(%arg0: i32, %arg1: i32, %arg2: memref<64x128xbf16, #tpu.memory_space<vmem>>, %arg3: memref<512x64xbf16, #tpu.memory_space<vmem>>, %arg4: memref<1x128xf32, #tpu.memory_space<vmem>>, %arg5: memref<1x128xf32, #tpu.memory_space<vmem>>, %arg6: memref<1x128xf32, #tpu.memory_space<vmem>>, %arg7: memref<1x128xf32, #tpu.memory_space<vmem>>, %arg8: memref<1x128xf32, #tpu.memory_space<vmem>>) attributes {dimension_semantics = [#tpu.dimension_semantics<parallel>, #tpu.dimension_semantics<arbitrary>], iteration_bounds = array<i64: 2, 2>, scalar_prefetch = 0 : i64, scratch_operands = 2 : i64, tpu.core_type = #tpu.core_type<tc>, window_params = [{transform_indices = @transform_0, window_bounds = array<i64: 64, 128>}, {transform_indices = @transform_1, window_bounds = array<i64: 512, 64>}, {transform_indices = @transform_2, window_bounds = array<i64: 1, 128>}, {transform_indices = @transform_3, window_bounds = array<i64: 1, 128>}, {transform_indices = @transform_4, window_bounds = array<i64: 1, 128>}]} {
    %c0_i32 = arith.constant 0 : i32
    %0 = arith.cmpi eq, %arg1, %c0_i32 : i32
    %1 = arith.extui %0 : i1 to i32
    %c0_i32_0 = arith.constant 0 : i32
    %2 = arith.cmpi ne, %1, %c0_i32_0 : i32
    scf.if %2 {
      %cst_17 = arith.constant 0xFF800000 : f32
      %26 = vector.broadcast %cst_17 : f32 to vector<1x128xf32>
      %c0_18 = arith.constant 0 : index
      %c0_19 = arith.constant 0 : index
      %27 = vector.load %arg7[%c0_18, %c0_19] : memref<1x128xf32, #tpu.memory_space<vmem>>, vector<1x128xf32>
      tpu.vector_store %arg7[%c0_18, %c0_19], %26 {strides = array<i32>} : memref<1x128xf32, #tpu.memory_space<vmem>>, vector<1x128xf32>,
      %cst_20 = arith.constant 0.000000e+00 : f32
      %28 = vector.broadcast %cst_20 : f32 to vector<1x128xf32>
      %c0_21 = arith.constant 0 : index
      %c0_22 = arith.constant 0 : index
      %29 = vector.load %arg8[%c0_21, %c0_22] : memref<1x128xf32, #tpu.memory_space<vmem>>, vector<1x128xf32>
      tpu.vector_store %arg8[%c0_21, %c0_22], %28 {strides = array<i32>} : memref<1x128xf32, #tpu.memory_space<vmem>>, vector<1x128xf32>,
    } else {
    }
    %c0 = arith.constant 0 : index
    %c0_1 = arith.constant 0 : index
    %3 = vector.load %arg3[%c0, %c0_1] : memref<512x64xbf16, #tpu.memory_space<vmem>>, vector<512x64xbf16>
    %c0_2 = arith.constant 0 : index
    %c0_3 = arith.constant 0 : index
    %4 = vector.load %arg2[%c0_2, %c0_3] : memref<64x128xbf16, #tpu.memory_space<vmem>>, vector<64x128xbf16>
    %cst = arith.constant dense<0.000000e+00> : vector<512x128xf32>
    %5 = tpu.matmul %3, %4, %cst {dimension_numbers = #tpu.dot_dimension_numbers<[1], [0], [0], [1], [0, 0, 1, 1], [], []>} : vector<512x64xbf16>, vector<64x128xbf16>, vector<512x128xf32> -> vector<512x128xf32>
    %cst_4 = arith.constant dense<0xFF800000> : vector<128xf32>
    %6 = vector.multi_reduction <maximumf>, %5, %cst_4 [0] : vector<512x128xf32> to vector<128xf32>
    %7 = vector.shape_cast %6 : vector<128xf32> to vector<1x128xf32>
    %c0_5 = arith.constant 0 : index
    %c0_6 = arith.constant 0 : index
    %8 = vector.load %arg7[%c0_5, %c0_6] : memref<1x128xf32, #tpu.memory_space<vmem>>, vector<1x128xf32>
    %9 = arith.maximumf %8, %7 : vector<1x128xf32>
    %c0_7 = arith.constant 0 : index
    %c0_8 = arith.constant 0 : index
    %10 = vector.load %arg7[%c0_7, %c0_8] : memref<1x128xf32, #tpu.memory_space<vmem>>, vector<1x128xf32>
    %11 = arith.subf %10, %9 : vector<1x128xf32>
    %12 = math.exp %11 : vector<1x128xf32>
    %c0_9 = arith.constant 0 : index
    %c0_10 = arith.constant 0 : index
    %13 = vector.load %arg8[%c0_9, %c0_10] : memref<1x128xf32, #tpu.memory_space<vmem>>, vector<1x128xf32>
    %14 = arith.mulf %12, %13 : vector<1x128xf32>
    %15 = vector.broadcast %9 : vector<1x128xf32> to vector<512x128xf32>
    %16 = arith.subf %5, %15 : vector<512x128xf32>
    %17 = math.exp %16 : vector<512x128xf32>
    %cst_11 = arith.constant dense<0.000000e+00> : vector<128xf32>
    %18 = vector.multi_reduction <add>, %17, %cst_11 [0] : vector<512x128xf32> to vector<128xf32>
    %19 = vector.shape_cast %18 : vector<128xf32> to vector<1x128xf32>
    %20 = arith.addf %14, %19 : vector<1x128xf32>
    %c0_12 = arith.constant 0 : index
    %c0_13 = arith.constant 0 : index
    %21 = vector.load %arg8[%c0_12, %c0_13] : memref<1x128xf32, #tpu.memory_space<vmem>>, vector<1x128xf32>
    tpu.vector_store %arg8[%c0_12, %c0_13], %20 {strides = array<i32>} : memref<1x128xf32, #tpu.memory_space<vmem>>, vector<1x128xf32>,
    %c0_14 = arith.constant 0 : index
    %c0_15 = arith.constant 0 : index
    %22 = vector.load %arg7[%c0_14, %c0_15] : memref<1x128xf32, #tpu.memory_space<vmem>>, vector<1x128xf32>
    tpu.vector_store %arg7[%c0_14, %c0_15], %9 {strides = array<i32>} : memref<1x128xf32, #tpu.memory_space<vmem>>, vector<1x128xf32>,
    %c1_i32 = arith.constant 1 : i32
    %23 = arith.cmpi eq, %arg1, %c1_i32 : i32
    %24 = arith.extui %23 : i1 to i32
    %c0_i32_16 = arith.constant 0 : i32
    %25 = arith.cmpi ne, %24, %c0_i32_16 : i32
    scf.if %25 {
      %c0_17 = arith.constant 0 : index
      %c0_18 = arith.constant 0 : index
      %26 = vector.load %arg7[%c0_17, %c0_18] : memref<1x128xf32, #tpu.memory_space<vmem>>, vector<1x128xf32>
      %c0_19 = arith.constant 0 : index
      %c0_20 = arith.constant 0 : index
      %27 = vector.load %arg4[%c0_19, %c0_20] : memref<1x128xf32, #tpu.memory_space<vmem>>, vector<1x128xf32>
      %c0_21 = arith.constant 0 : index
      %c0_22 = arith.constant 0 : index
      %28 = vector.load %arg5[%c0_21, %c0_22] : memref<1x128xf32, #tpu.memory_space<vmem>>, vector<1x128xf32>
      %29 = arith.subf %28, %26 : vector<1x128xf32>
      %30 = math.exp %29 : vector<1x128xf32>
      %c0_23 = arith.constant 0 : index
      %c0_24 = arith.constant 0 : index
      %31 = vector.load %arg8[%c0_23, %c0_24] : memref<1x128xf32, #tpu.memory_space<vmem>>, vector<1x128xf32>
      %32 = arith.subf %27, %26 : vector<1x128xf32>
      %33 = math.exp %32 : vector<1x128xf32>
      %34 = arith.subf %31, %33 : vector<1x128xf32>
      %cst_25 = arith.constant 0.000000e+00 : f32
      %35 = vector.broadcast %cst_25 : f32 to vector<1x128xf32>
      %36 = arith.maximumf %34, %35 : vector<1x128xf32>
      %37 = arith.addf %36, %30 : vector<1x128xf32>
      %38 = math.log %37 : vector<1x128xf32>
      %39 = arith.addf %26, %38 : vector<1x128xf32>
      %40 = arith.subf %39, %28 : vector<1x128xf32>
      %c0_26 = arith.constant 0 : index
      %c0_27 = arith.constant 0 : index
      %41 = vector.load %arg6[%c0_26, %c0_27] : memref<1x128xf32, #tpu.memory_space<vmem>>, vector<1x128xf32>
      tpu.vector_store %arg6[%c0_26, %c0_27], %40 {strides = array<i32>} : memref<1x128xf32, #tpu.memory_space<vmem>>, vector<1x128xf32>,
    } else {
    }
    return
  }
  func.func @transform_0(%arg0: i32, %arg1: i32) -> (i32, i32) {
    %c0_i32 = arith.constant 0 : i32
    %c0_i32_0 = arith.constant 0 : i32
    return %c0_i32, %arg0 : i32, i32
  }
  func.func @transform_1(%arg0: i32, %arg1: i32) -> (i32, i32) {
    %c0_i32 = arith.constant 0 : i32
    %c0_i32_0 = arith.constant 0 : i32
    return %arg1, %c0_i32 : i32, i32
  }
  func.func @transform_2(%arg0: i32, %arg1: i32) -> (i32, i32) {
    %c0_i32 = arith.constant 0 : i32
    %c0_i32_0 = arith.constant 0 : i32
    return %c0_i32, %arg0 : i32, i32
  }
  func.func @transform_3(%arg0: i32, %arg1: i32) -> (i32, i32) {
    %c0_i32 = arith.constant 0 : i32
    %c0_i32_0 = arith.constant 0 : i32
    return %c0_i32, %arg0 : i32, i32
  }
  func.func @transform_4(%arg0: i32, %arg1: i32) -> (i32, i32) {
    %c0_i32 = arith.constant 0 : i32
    %c0_i32_0 = arith.constant 0 : i32
    return %c0_i32, %arg0 : i32, i32
  }
}

</mosaic_0001>

<bundles_post_ra>
// kernel: tpu_custom_call.1
= control target key start
LH: loop header
LB: loop body
LE: loop exit
PB: predicated region body
PF: predicated region fallthrough
CT: control target
= control target key end

     0   :  { %s2493_s0 = inlined_call_operand.vmem [shape: bf16[64,256], index: 0, kind: input, shape index: {}]   ;;  %s2494_s1 = inlined_call_operand.vmem [shape: bf16[1024,64], index: 1, kind: input, shape index: {}]   ;;  %s2495_s2 = inlined_call_operand.vmem [shape: f32[1,256], index: 2, kind: input, shape index: {}]   ;;  %s2496_s3 = inlined_call_operand.vmem [shape: f32[1,256], index: 3, kind: input, shape index: {}]   ;;  %s2497_s4 = inlined_call_operand.hbm [shape: f32[1,256], index: 4, kind: output, shape index: {}]  }
   0x1   :  { %2512 = sst [smem:[#allocation23_spill]] %s2493_s0 }
   0x2   :  { %9 = vsyncpa [#allocation6], 0 }
   0x3   :  { %11 = vsyncpa [#allocation6 + $0x1], 0  ;;  %s1907_s15 = smov 0   ;;  %s1909_s16 = smov 0  }
   0x4   :  { %s1911_s17 = smov 0   ;;  %s1913_s18 = smov 0  }
   0x5   :  { %s1915_s19 = smov 0   ;;  %s1917_s20 = smov 0  }
   0x6   :  { %s1919_s21 = smov 0   ;;  %s1921_s22 = smov 0  }
   0x7 LB: > { %s1337_s23 = sadd.s32 4294967295, %s1878_s22   ;;  %s1338_s24 = sadd.s32 4294967294, %s1878_s22   ;;  %s1878_s22 = sphi %s1921_s22, %s17_s22   ;;  %s1874_s21 = sphi %s1919_s21, %s2562_s21   ;;  %s1870_s20 = sphi %s1917_s20, %s2561_s20   ;;  %s1866_s19 = sphi %s1915_s19, %s2560_s19   ;;  %s1862_s18 = sphi %s1913_s18, %s2559_s18   ;;  %s1858_s17 = sphi %s1911_s17, %s2558_s17   ;;  %s1854_s16 = sphi %s1909_s16, %s2557_s16   ;;  %s1850_s15 = sphi %s1907_s15, %s2556_s15  }
   0x8   : > { %s26_s25 = sadd.s32 1, %s1870_s20  ;;  %s29_s26 = sadd.s32 1, %s1874_s21 }
   0x9   : > { %p27_p0 = scmp.ge.s32.totalorder %s26_s25, 2  ;;  %p43_p1 = scmp.ne.s32.totalorder %s1858_s17, %s1854_s16 }
   0xa   : > { %p44_p2 = scmp.eq.s32.totalorder %s1878_s22, 0  ;;  %p151_p4 = scmp.eq.s32.totalorder %s1337_s23, 3 }
   0xb   : > { %s2564_s25 = smov (%p27_p0, %s26_s25), 0  ;;  %s2566_s26 = smov (!%p27_p0, %s29_s26), %s1874_s21 }
   0xc   : > { %2513 = sst [smem:[#allocation8_spill]] %s2564_s25  ;;  %p1957_p3 = por %p44_p2, %p43_p1 }
   0xd   : > { %p31_p5 = scmp.ge.s32.totalorder %s2566_s26, 2  ;;  %p156_p6 = scmp.ne.s32.totalorder %s1854_s16, %s1850_s15 }
   0xe   : > { %p1963_p7 = por %p151_p4, %p43_p1  ;;  %p157_p8 = scmp.eq.s32.totalorder %s1338_s24, 3 }
   0xf   : > { %s2568_s26 = smov (%p31_p5, %s2566_s26), 0  ;;  %s36_s5 = sadd.s32 1, %s1858_s17 }
  0x10   : > { %2516 = sst [smem:[#allocation9_spill]] %s2568_s26  ;;  %p1969_p9 = por %p157_p8, %p156_p6 }
  0x11   : > { %s33_s30 = ssub.s32 %s1874_s21, %s2568_s26  ;;  %p1340_p11 = scmp.ge.s32.totalorder %s1878_s22, 4 }
  0x12   : > { %p34_p10 = scmp.eq.s32.totalorder %s33_s30, 0 }
  0x13   : > { %173 = sbr.rel (%p1340_p11) target bundleno = 42 (0x2a), region = 16 }
  0x14   : > { %s1977_s6 = scalar_select %p34_p10, %s1858_s17, %s36_s5  }
  0x18   : > { %176 = sbr.rel (!%p1957_p3) target bundleno = 42 (0x2a), region = 20  ;;  %s178_s7 = sand.u32 (%p1957_p3), 1, %s1858_s17  }
  0x19   : > { %s1342_s8 = sshll.u32 (%p1957_p3), %s1874_s21, 2  ;;  %s1341_s9 = sshll.u32 (%p1957_p3), %s178_s7, 5 }
  0x1a   : > { %s2518_s0 = sld [smem:[#allocation23_spill]] (%p1957_p3)  ;;  %s180_s13 = scalar_lea.vmem (%p1957_p3), [#allocation4], %s1341_s9 }
  0x20   : > { %s182_s12 = scalar_lea.vmem %s2518_s0, %s1342_s8 }
  0x21   : > { %v199_v0 = vld [vmem:[%s182_s12] sm:$0xf]  ;;  %v201_v1 = vld [vmem:[%s182_s12 + $0x8] sm:$0xf]  ;;  %v203_v2 = vld [vmem:[%s182_s12 + $0x10] sm:$0xf] }
  0x22   : > { %200 = vst [vmem:[%s180_s13] sm:$0xf] %v199_v0  ;;  %v205_v3 = vld [vmem:[%s182_s12 + $0x18] sm:$0xf]  ;;  %v207_v4 = vld [vmem:[%s182_s12 + $0x20] sm:$0xf] }
  0x23   : > { %202 = vst [vmem:[%s180_s13 + $0x4] sm:$0xf] %v201_v1  ;;  %v209_v5 = vld [vmem:[%s182_s12 + $0x28] sm:$0xf]  ;;  %v211_v6 = vld [vmem:[%s182_s12 + $0x30] sm:$0xf] }
  0x24   : > { %204 = vst [vmem:[%s180_s13 + $0x8] sm:$0xf] %v203_v2  ;;  %v213_v7 = vld [vmem:[%s182_s12 + $0x38] sm:$0xf] }
  0x25   : > { %206 = vst [vmem:[%s180_s13 + $0xc] sm:$0xf] %v205_v3 }
  0x26   : > { %208 = vst [vmem:[%s180_s13 + $0x10] sm:$0xf] %v207_v4 }
  0x27   : > { %210 = vst [vmem:[%s180_s13 + $0x14] sm:$0xf] %v209_v5 }
  0x28   : > { %212 = vst [vmem:[%s180_s13 + $0x18] sm:$0xf] %v211_v6 }
  0x29   : > { %214 = vst [vmem:[%s180_s13 + $0x1c] sm:$0xf] %v213_v7 }
  0x2a PF: > { %p1343_p12 = scmp.ge.s32.totalorder %s1878_s22, 1  ;;  %p274_p13 = scmp.lt.s32.totalorder %s1878_s22, 5 }
  0x2c   : > { %p275_p0 = pnand %p1343_p12, %p274_p13 }
  0x2e   : > { %278 = sbr.rel (%p275_p0) target bundleno = 564 (0x234), region = 73 }
  0x33   : > { %s1990_s14 = sand.u32 1, %s1854_s16   ;;  %s1345_s23 = sshll.u32 %s1862_s18, 6 }
  0x34   : > { %s1344_s24 = sshll.u32 %s1990_s14, 5  ;;  %p317_p1 = scmp.lt.s32.totalorder %s1345_s23, 127 }
  0x35   : > { %p322_p2 = scmp.lt.s32.totalorder %s1866_s19, 1  ;;  %s283_s26 = scalar_lea.vmem [#allocation4], %s1344_s24 }
  0x36   : > { %s2570_s23 = smov (!%p317_p1, %s1345_s23), 127  ;;  %s315_s25 = scalar_lea.vmem [#allocation5], %s1990_s14 }
  0x37   : > { %s1996_s27 = scalar_select %p322_p2, %s1866_s19, 1 }
  0x38   : > { %s1346_s30 = sshll.u32 %s2570_s23, 2  ;;  %p1347_p3 = scmp.ne.s32.totalorder %s1862_s18, 0 }
  0x39   : > { %s2001_s8 = scalar_lea.vmem %s2494_s1, %s1346_s30  ;;  %s324_s11 = scalar_lea.vmem %s2495_s2, %s1996_s27 }
  0x3a   : > { %s327_s0 = scalar_lea.vmem %s2496_s3, %s1996_s27  ;;  %332 = sbr.rel (%p1347_p3) target bundleno = 66 (0x42), region = 81 }
  0x3f   : > { %v1880_v8 = vmov -inf   ;;  %v1881_v9 = vmov 0.0  }
  0x40   : > { %333 = vst [vmem:[#allocation2] sm:$0x1] %v1880_v8 }
  0x41   : > { %334 = vst [vmem:[#allocation3] sm:$0x1] %v1881_v9 }
  0x42 PF: > { %v1562_v10 = vld [vmem:[%s283_s26 + $0x18] sm:$0xff]  ;;  %v1561_v11 = vld [vmem:[%s283_s26 + $0x10] sm:$0xff]  ;;  %v1560_v12 = vld [vmem:[%s283_s26 + $0x8] sm:$0xff]  ;;  %vm591_vm0 = vcmask 523264   ;;  %p1524_p4 = scmp.ne.s32.totalorder %s1862_s18, 1 }
  0x43   : > { %692 = vmatpush.bf16.msra.mxu0 %v1562_v10  ;;  %1563 = vmatpush.bf16.msra.mxu1 %v1562_v10  ;;  %v1559_v13 = vld [vmem:[%s283_s26] sm:$0xff]  ;;  %v1529_v22 = vld [vmem:[%s2001_s8 + $0x10] sm:$0xff]  ;;  %v1530_v26 = vld [vmem:[%s2001_s8 + $0x18] sm:$0xff] }
  0x44   : > { %1564 = vmatpush.bf16.msra.mxu2 %v1562_v10  ;;  %1565 = vmatpush.bf16.msra.mxu3 %v1562_v10  ;;  %v1527_v14 = vld [vmem:[%s2001_s8] sm:$0xff]  ;;  %v1528_v18 = vld [vmem:[%s2001_s8 + $0x8] sm:$0xff]  ;;  %v1537_v23 = vld [vmem:[%s2001_s8 + $0x50] sm:$0xff] }
  0x45   : > { %v1535_v15 = vld [vmem:[%s2001_s8 + $0x40] sm:$0xff]  ;;  %v1536_v19 = vld [vmem:[%s2001_s8 + $0x48] sm:$0xff]  ;;  %v1545_v24 = vld [vmem:[%s2001_s8 + $0x90] sm:$0xff] }
  0x46   : > { %v1543_v16 = vld [vmem:[%s2001_s8 + $0x80] sm:$0xff]  ;;  %v1544_v20 = vld [vmem:[%s2001_s8 + $0x88] sm:$0xff]  ;;  %v1553_v25 = vld [vmem:[%s2001_s8 + $0xd0] sm:$0xff] }
  0x47   : > { %693 = vmatpush.bf16.msra.mxu0 %v1561_v11  ;;  %1566 = vmatpush.bf16.msra.mxu1 %v1561_v11  ;;  %v1551_v17 = vld [vmem:[%s2001_s8 + $0xc0] sm:$0xff]  ;;  %v1552_v21 = vld [vmem:[%s2001_s8 + $0xc8] sm:$0xff]  ;;  %v1538_v27 = vld [vmem:[%s2001_s8 + $0x58] sm:$0xff] }
  0x48   : > { %1567 = vmatpush.bf16.msra.mxu2 %v1561_v11  ;;  %1568 = vmatpush.bf16.msra.mxu3 %v1561_v11  ;;  %v1546_v28 = vld [vmem:[%s2001_s8 + $0x98] sm:$0xff]  ;;  %v1531_v30 = vld [vmem:[%s2001_s8 + $0x20] sm:$0xff]  ;;  %v1532_v34 = vld [vmem:[%s2001_s8 + $0x28] sm:$0xff] }
  0x49   : > { %v1554_v29 = vld [vmem:[%s2001_s8 + $0xd8] sm:$0xff]  ;;  %v1539_v31 = vld [vmem:[%s2001_s8 + $0x60] sm:$0xff]  ;;  %v1540_v35 = vld [vmem:[%s2001_s8 + $0x68] sm:$0xff] }
  0x4a   : > { %v1547_v32 = vld [vmem:[%s2001_s8 + $0xa0] sm:$0xff]  ;;  %v1548_v36 = vld [vmem:[%s2001_s8 + $0xa8] sm:$0xff]  ;;  %v1533_v38 = vld [vmem:[%s2001_s8 + $0x30] sm:$0xff] }
  0x4b   : > { %694 = vmatpush.bf16.msra.mxu0 %v1560_v12  ;;  %1569 = vmatpush.bf16.msra.mxu1 %v1560_v12  ;;  %v1555_v33 = vld [vmem:[%s2001_s8 + $0xe0] sm:$0xff]  ;;  %v1556_v37 = vld [vmem:[%s2001_s8 + $0xe8] sm:$0xff]  ;;  %v1541_v39 = vld [vmem:[%s2001_s8 + $0x70] sm:$0xff] }
  0x4c   : > { %1570 = vmatpush.bf16.msra.mxu2 %v1560_v12  ;;  %1571 = vmatpush.bf16.msra.mxu3 %v1560_v12  ;;  %v1549_v40 = vld [vmem:[%s2001_s8 + $0xb0] sm:$0xff]  ;;  %v1534_v42 = vld [vmem:[%s2001_s8 + $0x38] sm:$0xff] }
  0x4d   : > { %v1557_v41 = vld [vmem:[%s2001_s8 + $0xf0] sm:$0xff]  ;;  %v1542_v43 = vld [vmem:[%s2001_s8 + $0x78] sm:$0xff] }
  0x4e   : > { %v1550_v44 = vld [vmem:[%s2001_s8 + $0xb8] sm:$0xff] }
  0x4f   : > { %695 = vmatpush.bf16.msra.mxu0 %v1559_v13  ;;  %1572 = vmatpush.bf16.msra.mxu1 %v1559_v13  ;;  %v1558_v45 = vld [vmem:[%s2001_s8 + $0xf8] sm:$0xff] }
  0x50   : > { %1573 = vmatpush.bf16.msra.mxu2 %v1559_v13  ;;  %1574 = vmatpush.bf16.msra.mxu3 %v1559_v13 }
  0x52   : > { %1492 = vmatmul.msk.bf16.vlgmr.msra.gmra.mxu0 %vm591_vm0, %v1527_v14  ;;  %1500 = vmatmul.msk.bf16.vlgmr.msra.gmra.mxu1 %vm591_vm0, %v1535_v15 }
  0x53   : > { %1508 = vmatmul.msk.bf16.vlgmr.msra.gmra.mxu2 %vm591_vm0, %v1543_v16  ;;  %1516 = vmatmul.msk.bf16.vlgmr.msra.gmra.mxu3 %vm591_vm0, %v1551_v17 }
  0x62   : > { %1493 = vmatmul.msk.bf16.gmra.mxu0 %vm591_vm0, %v1528_v18  ;;  %1501 = vmatmul.msk.bf16.gmra.mxu1 %vm591_vm0, %v1536_v19 }
  0x63   : > { %1509 = vmatmul.msk.bf16.gmra.mxu2 %vm591_vm0, %v1544_v20  ;;  %1517 = vmatmul.msk.bf16.gmra.mxu3 %vm591_vm0, %v1552_v21 }
  0x72   : > { %1494 = vmatmul.msk.bf16.gmra.mxu0 %vm591_vm0, %v1529_v22  ;;  %1502 = vmatmul.msk.bf16.gmra.mxu1 %vm591_vm0, %v1537_v23 }
  0x73   : > { %1510 = vmatmul.msk.bf16.gmra.mxu2 %vm591_vm0, %v1545_v24  ;;  %1518 = vmatmul.msk.bf16.gmra.mxu3 %vm591_vm0, %v1553_v25 }
  0x82   : > { %1495 = vmatmul.msk.bf16.gmra.mxu0 %vm591_vm0, %v1530_v26  ;;  %1503 = vmatmul.msk.bf16.gmra.mxu1 %vm591_vm0, %v1538_v27 }
  0x83   : > { %1511 = vmatmul.msk.bf16.gmra.mxu2 %vm591_vm0, %v1546_v28  ;;  %1519 = vmatmul.msk.bf16.gmra.mxu3 %vm591_vm0, %v1554_v29 }
  0x92   : > { %1496 = vmatmul.msk.bf16.gmra.mxu0 %vm591_vm0, %v1531_v30  ;;  %1504 = vmatmul.msk.bf16.gmra.mxu1 %vm591_vm0, %v1539_v31 }
  0x93   : > { %1512 = vmatmul.msk.bf16.gmra.mxu2 %vm591_vm0, %v1547_v32  ;;  %1520 = vmatmul.msk.bf16.gmra.mxu3 %vm591_vm0, %v1555_v33 }
  0xa2   : > { %1497 = vmatmul.msk.bf16.gmra.mxu0 %vm591_vm0, %v1532_v34  ;;  %1505 = vmatmul.msk.bf16.gmra.mxu1 %vm591_vm0, %v1540_v35 }
  0xa3   : > { %1513 = vmatmul.msk.bf16.gmra.mxu2 %vm591_vm0, %v1548_v36  ;;  %1521 = vmatmul.msk.bf16.gmra.mxu3 %vm591_vm0, %v1556_v37 }
  0xb2   : > { %1498 = vmatmul.msk.bf16.gmra.mxu0 %vm591_vm0, %v1533_v38  ;;  %1506 = vmatmul.msk.bf16.gmra.mxu1 %vm591_vm0, %v1541_v39 }
  0xb3   : > { %1514 = vmatmul.msk.bf16.gmra.mxu2 %vm591_vm0, %v1549_v40  ;;  %1522 = vmatmul.msk.bf16.gmra.mxu3 %vm591_vm0, %v1557_v41 }
  0xc2   : > { %1499 = vmatmul.msk.bf16.gmra.mxu0 %vm591_vm0, %v1534_v42  ;;  %1507 = vmatmul.msk.bf16.gmra.mxu1 %vm591_vm0, %v1542_v43 }
  0xc3   : > { %1515 = vmatmul.msk.bf16.gmra.mxu2 %vm591_vm0, %v1550_v44  ;;  %1523 = vmatmul.msk.bf16.gmra.mxu3 %vm591_vm0, %v1558_v45 }
  0xcf   : > { %v2077_v46 = vpop.f32.mrf.mxu0  ;;  %v2079_v47 = vpop.f32.mrf.mxu1 }
  0xd6   : > { %v2081_v48 = vpop.f32.mrf.mxu2  ;;  %v2083_v49 = vpop.f32.mrf.mxu3 }
  0xd7   : > { %2519 = vst [vmem:[#allocation10_spill] sm:$0xff] %v2083_v49  ;;  %v2085_v50 = vpop.f32.mrf.mxu0  ;;  %v2087_v51 = vpop.f32.mrf.mxu1 }
  0xde   : > { %v2089_v52 = vpop.f32.mrf.mxu2  ;;  %v2091_v53 = vpop.f32.mrf.mxu3 }
  0xdf   : > { %2520 = vst [vmem:[#allocation11_spill] sm:$0xff] %v2091_v53  ;;  %v2093_v54 = vpop.f32.mrf.mxu0  ;;  %v2095_v55 = vpop.f32.mrf.mxu1 }
  0xe0   : > { %v901_v0 = vmax.f32 %v2095_v55, %v2083_v49 }
  0xe6   : > { %v2097_v56 = vpop.f32.mrf.mxu2  ;;  %v2099_v57 = vpop.f32.mrf.mxu3 }
  0xe7   : > { %2521 = vst [vmem:[#allocation12_spill] sm:$0xff] %v2099_v57  ;;  %v2101_v58 = vpop.f32.mrf.mxu0  ;;  %v2103_v59 = vpop.f32.mrf.mxu1 }
  0xe8   : > { %v871_v5 = vmax.f32 %v2103_v59, %v901_v0 }
  0xea   : > { %v875_v6 = vmax.f32 %v871_v5, %v2097_v56 }
  0xec   : > { %v879_v11 = vmax.f32 %v875_v6, %v2091_v53 }
  0xee   : > { %v2105_v60 = vpop.f32.mrf.mxu2  ;;  %v2107_v61 = vpop.f32.mrf.mxu3 }
  0xef   : > { %2522 = vst [vmem:[#allocation13_spill] sm:$0xff] %v2107_v61  ;;  %v2109_v62 = vpop.f32.mrf.mxu0  ;;  %v2111_v63 = vpop.f32.mrf.mxu1  ;;  %v883_v12 = vmax.f32 %v879_v11, %v2105_v60 }
  0xf0   : > { %v857_v44 = vmax.f32 %v2077_v46, %v2109_v62 }
  0xf1   : > { %v887_v17 = vmax.f32 %v883_v12, %v2099_v57 }
  0xf3   : > { %v902_v18 = vmax.f32 %v2107_v61, %v887_v17 }
  0xf6   : > { %v2115_v1 = vpop.f32.mrf.mxu2  ;;  %v2117_v2 = vpop.f32.mrf.mxu3 }
  0xf7   : > { %2523 = vst [vmem:[#allocation14_spill] sm:$0xff] %v2117_v2  ;;  %v2119_v3 = vpop.f32.mrf.mxu0  ;;  %v2121_v4 = vpop.f32.mrf.mxu1 }
  0xfe   : > { %v2125_v7 = vpop.f32.mrf.mxu2  ;;  %v2127_v8 = vpop.f32.mrf.mxu3 }
  0xff   : > { %2524 = vst [vmem:[#allocation15_spill] sm:$0xff] %v2127_v8  ;;  %v2129_v9 = vpop.f32.mrf.mxu0  ;;  %v2131_v10 = vpop.f32.mrf.mxu1 }
 0x100   : > { %v905_v19 = vmax.f32 %v2131_v10, %v902_v18 }
 0x102   : > { %v909_v24 = vmax.f32 %v905_v19, %v2117_v2 }
 0x106   : > { %v2135_v13 = vpop.f32.mrf.mxu2  ;;  %v2137_v14 = vpop.f32.mrf.mxu3 }
 0x107   : > { %2525 = vst [vmem:[#allocation16_spill] sm:$0xff] %v2137_v14  ;;  %v2139_v15 = vpop.f32.mrf.mxu0  ;;  %v2141_v16 = vpop.f32.mrf.mxu1 }
 0x108   : > { %v913_v25 = vmax.f32 %v909_v24, %v2141_v16  ;;  %v858_v24 = vmax.f32 %v2085_v50, %v2119_v3 }
 0x10a   : > { %v872_v30 = vmax.f32 %v2135_v13, %v913_v25 }
 0x10c   : > { %v876_v31 = vmax.f32 %v872_v30, %v2127_v8 }
 0x10e   : > { %v2146_v20 = vpop.f32.mrf.mxu2  ;;  %v2148_v21 = vpop.f32.mrf.mxu3 }
 0x10f   : > { %2526 = vst [vmem:[#allocation17_spill] sm:$0xff] %v2148_v21  ;;  %v2150_v22 = vpop.f32.mrf.mxu0  ;;  %v2152_v23 = vpop.f32.mrf.mxu1  ;;  %v880_v36 = vmax.f32 %v876_v31, %v2146_v20 }
 0x110   : > { %v861_v45 = vmax.f32 %v857_v44, %v2150_v22 }
 0x111   : > { %v884_v37 = vmax.f32 %v880_v36, %v2137_v14 }
 0x113   : > { %v888_v42 = vmax.f32 %v884_v37, %v2148_v21 }
 0x116   : > { %v2156_v26 = vpop.f32.mrf.mxu2  ;;  %v2158_v27 = vpop.f32.mrf.mxu3 }
 0x117   : > { %2527 = vst [vmem:[#allocation18_spill] sm:$0xff] %v2158_v27  ;;  %v2160_v28 = vpop.f32.mrf.mxu0  ;;  %v2162_v29 = vpop.f32.mrf.mxu1 }
 0x118   : > { %v862_v31 = vmax.f32 %v858_v24, %v2160_v28 }
 0x11e   : > { %v2166_v32 = vpop.f32.mrf.mxu2  ;;  %v2168_v33 = vpop.f32.mrf.mxu3 }
 0x11f   : > { %2528 = vst [vmem:[#allocation19_spill] sm:$0xff] %v2168_v33  ;;  %v2170_v34 = vpop.f32.mrf.mxu0  ;;  %v2172_v35 = vpop.f32.mrf.mxu1 }
 0x120   : > { %v891_v43 = vmax.f32 %v2172_v35, %v888_v42 }
 0x122   : > { %v895_v0 = vmax.f32 %v891_v43, %v2158_v27 }
 0x126   : > { %v2176_v38 = vpop.f32.mrf.mxu2  ;;  %v2178_v39 = vpop.f32.mrf.mxu3 }
 0x127   : > { %2529 = vst [vmem:[#allocation20_spill] sm:$0xff] %v2178_v39  ;;  %v2180_v40 = vpop.f32.mrf.mxu0  ;;  %v2182_v41 = vpop.f32.mrf.mxu1 }
 0x128   : > { %v899_v11 = vmax.f32 %v895_v0, %v2182_v41 }
 0x12a   : > { %v903_v25 = vmax.f32 %v899_v11, %v2176_v38 }
 0x12c   : > { %v906_v43 = vmax.f32 %v2168_v33, %v903_v25 }
 0x12e   : > { %v2190_v5 = vpop.f32.mrf.mxu2  ;;  %v2198_v18 = vpop.f32.mrf.mxu3 }
 0x12f   : > { %v2192_v6 = vpop.f32.mrf.mxu0  ;;  %v2196_v17 = vpop.f32.mrf.mxu1  ;;  %2530 = vst [vmem:[#allocation21_spill] sm:$0xff] %v2198_v18  ;;  %v910_v24 = vmax.f32 %v906_v43, %v2190_v5 }
 0x130   : > { %v865_v12 = vmax.f32 %v861_v45, %v2192_v6 }
 0x132   : > { %v869_v19 = vmax.f32 %v865_v12, %v2079_v47 }
 0x134   : > { %v873_v30 = vmax.f32 %v869_v19, %v2111_v63 }
 0x136   : > { %v877_v36 = vmax.f32 %v873_v30, %v2152_v23  ;;  %v2209_v42 = vpop.f32.mrf.mxu2  ;;  %v2218_v19 = vpop.f32.mrf.mxu3 }
 0x137   : > { %v2207_v37 = vpop.f32.mrf.mxu0  ;;  %v2216_v12 = vpop.f32.mrf.mxu1 }
 0x138   : > { %v881_v44 = vmax.f32 %v877_v36, %v2196_v17  ;;  %v866_v45 = vmax.f32 %v862_v31, %v2207_v37  ;;  %v859_v31 = vmax.f32 %v2093_v54, %v2129_v9 }
 0x13a   : > { %v885_v0 = vmax.f32 %v881_v44, %v2081_v48  ;;  %v870_v11 = vmax.f32 %v866_v45, %v2087_v51  ;;  %v914_v44 = vmax.f32 %v910_v24, %v2178_v39  ;;  %v860_v39 = vmax.f32 %v2101_v58, %v2139_v15 }
 0x13c   : > { %v874_v30 = vmax.f32 %v870_v11, %v2121_v4  ;;  %v889_v27 = vmax.f32 %v885_v0, %v2115_v1  ;;  %v863_v11 = vmax.f32 %v859_v31, %v2170_v34 }
 0x13e   : > { %v878_v25 = vmax.f32 %v874_v30, %v2162_v29  ;;  %v893_v36 = vmax.f32 %v889_v27, %v2156_v26  ;;  %v2232_v43 = vpop.f32.mrf.mxu2  ;;  %v2241_v24 = vpop.f32.mrf.mxu3 }
 0x13f   : > { %v2225_v33 = vpop.f32.mrf.mxu0  ;;  %v2239_v2 = vpop.f32.mrf.mxu1 }
 0x140   : > { %v882_v45 = vmax.f32 %v878_v25, %v2216_v12  ;;  %v897_v21 = vmax.f32 %v893_v36, %v2209_v42  ;;  %v867_v14 = vmax.f32 %v863_v11, %v2225_v33 }
 0x142   : > { %v886_v0 = vmax.f32 %v882_v45, %v2089_v52  ;;  %v917_v30 = vmax.f32 %v897_v21, %v914_v44  ;;  %v864_v45 = vmax.f32 %v860_v39, %v2180_v40 }
 0x144   : > { %v892_v27 = vmax.f32 %v2198_v18, %v917_v30  ;;  %v890_v8 = vmax.f32 %v886_v0, %v2125_v7 }
 0x146   : > { %v896_v25 = vmax.f32 %v892_v27, %v867_v14  ;;  %v894_v36 = vmax.f32 %v890_v8, %v2166_v32  ;;  %v2251_v0 = vpop.f32.mrf.mxu2  ;;  %v2257_v18 = vpop.f32.mrf.mxu3 }
 0x147   : > { %v2248_v44 = vpop.f32.mrf.mxu0  ;;  %v2255_v8 = vpop.f32.mrf.mxu1 }
 0x148   : > { %v900_v31 = vmax.f32 %v896_v25, %v2239_v2  ;;  %v898_v21 = vmax.f32 %v894_v36, %v2232_v43  ;;  %v868_v14 = vmax.f32 %v864_v45, %v2248_v44 }
 0x14a   : > { %v904_v11 = vmax.f32 %v900_v31, %v898_v21 }
 0x14c   : > { %v907_v30 = vmax.f32 %v2218_v19, %v904_v11 }
 0x14e   : > { %v911_v27 = vmax.f32 %v907_v30, %v868_v14  ;;  %v2262_v57 = vpop.f32.mrf.mxu2  ;;  %v2266_v21 = vpop.f32.mrf.mxu3 }
 0x150   : > { %v915_v25 = vmax.f32 %v911_v27, %v2255_v8  ;;  %v2269_v27 = vld [vmem:[#allocation2] sm:$0x1] }
 0x152   : > { %v908_v36 = vmax.f32 %v2251_v0, %v915_v25 }
 0x154   : > { %v912_v61 = vmax.f32 %v908_v36, %v2241_v24 }
 0x156   : > { %v916_v39 = vmax.f32 %v912_v61, %v2262_v57 }
 0x158   : > { %v918_v31 = vmax.f32 %v2257_v18, %v916_v39 }
 0x15a   : > { %v919_v45 = vmax.f32 %v2266_v21, %v918_v31 }
 0x15c   : > { %v920_v11 = vrot.slane %v919_v45, 4 }
 0x15e   : > { %v921_v30 = vmax.f32 %v919_v45, %v920_v11 }
 0x160   : > { %v922_v14 = vrot.slane %v921_v30, 2 }
 0x162   : > { %v923_v53 = vmax.f32 %v921_v30, %v922_v14 }
 0x164   : > { %v924_v49 = vrot.slane %v923_v53, 1 }
 0x166   : > { %v925_v25 = vmax.f32 %v923_v53, %v924_v49 }
 0x168   : > { %v2272_v36 = vmax.f32 %v2269_v27, %v925_v25 }
 0x16a   : > { %2531 = vst [vmem:[#allocation22_spill] sm:$0xff] %v2272_v36  ;;  %v2278_v39 = vperm.slane %v2272_v36, 0 }
 0x16b   : > { %1199 = vst [vmem:[#allocation2] sm:$0x1] %v2272_v36 }
 0x16c   : > { %v936_v61 = vsub.f32 %v2077_v46, %v2278_v39  ;;  %v937_v49 = vsub.f32 %v2085_v50, %v2278_v39  ;;  %v938_v53 = vsub.f32 %v2093_v54, %v2278_v39  ;;  %v939_v30 = vsub.f32 %v2101_v58, %v2278_v39 }
 0x16d   : > { %v940_v14 = vsub.f32 %v2109_v62, %v2278_v39  ;;  %v941_v46 = vsub.f32 %v2119_v3, %v2278_v39  ;;  %v942_v50 = vsub.f32 %v2129_v9, %v2278_v39  ;;  %v943_v58 = vsub.f32 %v2139_v15, %v2278_v39 }
 0x16e   : > { %v1000_v45 = vmul.f32 1.442695, %v936_v61  ;;  %v1002_v11 = vmul.f32 1.442695, %v937_v49  ;;  %v1004_v25 = vmul.f32 1.442695, %v938_v53  ;;  %v944_v62 = vsub.f32 %v2150_v22, %v2278_v39 }
 0x16f   : > { %v1006_v31 = vmul.f32 1.442695, %v939_v30  ;;  %v1008_v61 = vmul.f32 1.442695, %v940_v14  ;;  %v1012_v53 = vmul.f32 1.442695, %v942_v50  ;;  %v945_v30 = vsub.f32 %v2160_v28, %v2278_v39 }
 0x170   : > { %1648 = vpow2.f32 %v1000_v45  ;;  %v1010_v45 = vmul.f32 1.442695, %v941_v46  ;;  %v1014_v9 = vmul.f32 1.442695, %v943_v58  ;;  %v946_v36 = vsub.f32 %v2170_v34, %v2278_v39 }
 0x171   : > { %1650 = vpow2.f32 %v1002_v11  ;;  %v1016_v15 = vmul.f32 1.442695, %v944_v62  ;;  %v947_v22 = vsub.f32 %v2180_v40, %v2278_v39  ;;  %v1018_v50 = vmul.f32 1.442695, %v945_v30 }
 0x172   : > { %1652 = vpow2.f32 %v1004_v25  ;;  %v948_v28 = vsub.f32 %v2192_v6, %v2278_v39  ;;  %v949_v34 = vsub.f32 %v2207_v37, %v2278_v39  ;;  %v950_v40 = vsub.f32 %v2225_v33, %v2278_v39 }
 0x173   : > { %1654 = vpow2.f32 %v1006_v31  ;;  %v1022_v62 = vmul.f32 1.442695, %v947_v22  ;;  %v951_v6 = vsub.f32 %v2248_v44, %v2278_v39  ;;  %v952_v37 = vsub.f32 %v2079_v47, %v2278_v39 }
 0x174   : > { %1656 = vpow2.f32 %v1008_v61  ;;  %v953_v33 = vsub.f32 %v2087_v51, %v2278_v39  ;;  %v954_v44 = vsub.f32 %v2095_v55, %v2278_v39  ;;  %v955_v47 = vsub.f32 %v2103_v59, %v2278_v39 }
 0x175   : > { %1658 = vpow2.f32 %v1010_v45  ;;  %v1030_v22 = vmul.f32 1.442695, %v951_v6  ;;  %v956_v51 = vsub.f32 %v2111_v63, %v2278_v39  ;;  %v957_v55 = vsub.f32 %v2121_v4, %v2278_v39 }
 0x176   : > { %v1649_v54 = vpop.eup %1648  ;;  %1660 = vpow2.f32 %v1012_v53  ;;  %v958_v59 = vsub.f32 %v2131_v10, %v2278_v39  ;;  %v959_v63 = vsub.f32 %v2141_v16, %v2278_v39  ;;  %v960_v4 = vsub.f32 %v2152_v23, %v2278_v39 }
 0x177   : > { %v1651_v49 = vpop.eup %1650  ;;  %1662 = vpow2.f32 %v1014_v9  ;;  %v961_v10 = vsub.f32 %v2162_v29, %v2278_v39  ;;  %v962_v16 = vsub.f32 %v2172_v35, %v2278_v39  ;;  %v963_v23 = vsub.f32 %v2182_v41, %v2278_v39 }
 0x178   : > { %v1128_v11 = vadd.f32 %v1651_v49, %v1649_v54  ;;  %v1653_v3 = vpop.eup %1652  ;;  %1664 = vpow2.f32 %v1016_v15  ;;  %v1020_v49 = vmul.f32 1.442695, %v946_v36  ;;  %v1026_v36 = vmul.f32 1.442695, %v949_v34 }
 0x179   : > { %v1655_v25 = vpop.eup %1654  ;;  %1666 = vpow2.f32 %v1018_v50  ;;  %v1028_v15 = vmul.f32 1.442695, %v950_v40  ;;  %v1038_v40 = vmul.f32 1.442695, %v955_v47  ;;  %v964_v29 = vsub.f32 %v2196_v17, %v2278_v39 }
 0x17a   : > { %v1129_v14 = vadd.f32 %v1653_v3, %v1128_v11  ;;  %v1657_v46 = vpop.eup %1656  ;;  %1668 = vpow2.f32 %v1020_v49  ;;  %v1024_v3 = vmul.f32 1.442695, %v948_v28  ;;  %v965_v35 = vsub.f32 %v2216_v12, %v2278_v39 }
 0x17b   : > { %v1659_v54 = vpop.eup %1658  ;;  %1670 = vpow2.f32 %v1022_v62  ;;  %v1036_v62 = vmul.f32 1.442695, %v954_v44  ;;  %v966_v41 = vsub.f32 %v2239_v2, %v2278_v39  ;;  %v967_v17 = vsub.f32 %v2255_v8, %v2278_v39 }
 0x17c   : > { %v1130_v31 = vadd.f32 %v1655_v25, %v1129_v14  ;;  %v1661_v45 = vpop.eup %1660  ;;  %1672 = vpow2.f32 %v1024_v3  ;;  %v968_v12 = vsub.f32 %v2081_v48, %v2278_v39  ;;  %v969_v2 = vsub.f32 %v2089_v52, %v2278_v39 }
 0x17d   : > { %v1663_v11 = vpop.eup %1662  ;;  %1674 = vpow2.f32 %v1026_v36  ;;  %v970_v8 = vsub.f32 %v2097_v56, %v2278_v39  ;;  %v971_v48 = vsub.f32 %v2105_v60, %v2278_v39  ;;  %v972_v52 = vsub.f32 %v2115_v1, %v2278_v39 }
 0x17e   : > { %v1131_v61 = vadd.f32 %v1657_v46, %v1130_v31  ;;  %v1665_v9 = vpop.eup %1664  ;;  %1676 = vpow2.f32 %v1028_v15  ;;  %v1044_v15 = vmul.f32 1.442695, %v958_v59  ;;  %v973_v56 = vsub.f32 %v2125_v7, %v2278_v39 }
 0x17f   : > { %v1667_v25 = vpop.eup %1666  ;;  %1678 = vpow2.f32 %v1030_v22  ;;  %v974_v60 = vsub.f32 %v2135_v13, %v2278_v39  ;;  %v975_v1 = vsub.f32 %v2146_v20, %v2278_v39  ;;  %v976_v7 = vsub.f32 %v2156_v26, %v2278_v39 }
 0x180   : > { %v1132_v58 = vadd.f32 %v1659_v54, %v1131_v61  ;;  %v1669_v46 = vpop.eup %1668  ;;  %v1032_v54 = vmul.f32 1.442695, %v952_v37  ;;  %v977_v13 = vsub.f32 %v2166_v32, %v2278_v39  ;;  %v978_v20 = vsub.f32 %v2176_v38, %v2278_v39 }
 0x181   : > { %v1671_v61 = vpop.eup %1670  ;;  %v979_v26 = vsub.f32 %v2190_v5, %v2278_v39  ;;  %v2532_v38 = vsub.f32 %v2209_v42, %v2278_v39  ;;  %v2533_v5 = vsub.f32 %v2232_v43, %v2278_v39  ;;  %v2537_v43 = vsub.f32 %v2262_v57, %v2278_v39 }
 0x182   : > { %v1133_v53 = vadd.f32 %v1661_v45, %v1132_v58  ;;  %v1673_v49 = vpop.eup %1672  ;;  %v1034_v58 = vmul.f32 1.442695, %v953_v33  ;;  %1680 = vpow2.f32 %v1032_v54  ;;  %v1046_v33 = vmul.f32 1.442695, %v959_v63 }
 0x183   : > { %v1675_v34 = vpop.eup %1674  ;;  %v1062_v63 = vmul.f32 1.442695, %v967_v17  ;;  %v1084_v32 = vmul.f32 1.442695, %v978_v20 }
 0x184   : > { %v1134_v30 = vadd.f32 %v1663_v11, %v1133_v53  ;;  %v1677_v11 = vpop.eup %1676  ;;  %1682 = vpow2.f32 %v1034_v58  ;;  %v1052_v58 = vmul.f32 1.442695, %v962_v16  ;;  %v1070_v16 = vmul.f32 1.442695, %v971_v48 }
 0x185   : > { %1684 = vpow2.f32 %v1036_v62 }
 0x186   : > { %v1135_v14 = vadd.f32 %v1665_v9, %v1134_v30  ;;  %v1679_v30 = vpop.eup %1678  ;;  %v1040_v9 = vmul.f32 1.442695, %v956_v51  ;;  %1686 = vpow2.f32 %v1038_v40  ;;  %v1054_v51 = vmul.f32 1.442695, %v963_v23 }
 0x188   : > { %v1136_v31 = vadd.f32 %v1667_v25, %v1135_v14  ;;  %v1681_v36 = vpop.eup %1680  ;;  %v1042_v14 = vmul.f32 1.442695, %v957_v55  ;;  %1688 = vpow2.f32 %v1040_v9  ;;  %v1060_v9 = vmul.f32 1.442695, %v966_v41 }
 0x18a   : > { %v1137_v50 = vadd.f32 %v1669_v46, %v1136_v31  ;;  %v1683_v37 = vpop.eup %1682  ;;  %1690 = vpow2.f32 %v1042_v14 }
 0x18b   : > { %v1685_v46 = vpop.eup %1684  ;;  %1692 = vpow2.f32 %v1044_v15 }
 0x18c   : > { %v1138_v28 = vadd.f32 %v1671_v61, %v1137_v50  ;;  %v1687_v50 = vpop.eup %1686  ;;  %v1048_v61 = vmul.f32 1.442695, %v960_v4  ;;  %1694 = vpow2.f32 %v1046_v33  ;;  %v1068_v33 = vmul.f32 1.442695, %v970_v8  ;;  %v2534_v8 = vld [vmem:[#allocation10_spill] sm:$0xff] }
 0x18e   : > { %v1139_v45 = vadd.f32 %v1673_v49, %v1138_v28  ;;  %v1689_v54 = vpop.eup %1688  ;;  %v1050_v28 = vmul.f32 1.442695, %v961_v10  ;;  %1696 = vpow2.f32 %v1048_v61 }
 0x190   : > { %v1140_v53 = vadd.f32 %v1675_v34, %v1139_v45  ;;  %v1691_v47 = vpop.eup %1690  ;;  %1698 = vpow2.f32 %v1050_v28 }
 0x191   : > { %v1693_v34 = vpop.eup %1692  ;;  %1700 = vpow2.f32 %v1052_v58  ;;  %v1076_v58 = vmul.f32 1.442695, %v974_v60 }
 0x192   : > { %v1141_v3 = vadd.f32 %v1677_v11, %v1140_v53  ;;  %v1695_v53 = vpop.eup %1694  ;;  %v1056_v11 = vmul.f32 1.442695, %v964_v29  ;;  %1702 = vpow2.f32 %v1054_v51 }
 0x194   : > { %v1142_v6 = vadd.f32 %v1679_v30, %v1141_v3  ;;  %v1697_v40 = vpop.eup %1696  ;;  %v1058_v3 = vmul.f32 1.442695, %v965_v35  ;;  %1704 = vpow2.f32 %v1056_v11  ;;  %v1078_v35 = vmul.f32 1.442695, %v975_v1 }
 0x196   : > { %v1143_v25 = vadd.f32 %v1681_v36, %v1142_v6  ;;  %v1699_v59 = vpop.eup %1698  ;;  %1706 = vpow2.f32 %v1058_v3 }
 0x197   : > { %v1701_v36 = vpop.eup %1700  ;;  %1708 = vpow2.f32 %v1060_v9 }
 0x198   : > { %v1144_v31 = vadd.f32 %v1683_v37, %v1143_v25  ;;  %v1703_v25 = vpop.eup %1702  ;;  %v1064_v37 = vmul.f32 1.442695, %v968_v12  ;;  %1710 = vpow2.f32 %v1062_v63  ;;  %v1090_v63 = vmul.f32 1.442695, %v2533_v5 }
 0x19a   : > { %v1145_v22 = vadd.f32 %v1685_v46, %v1144_v31  ;;  %v1705_v15 = vpop.eup %1704  ;;  %v1066_v31 = vmul.f32 1.442695, %v969_v2  ;;  %1712 = vpow2.f32 %v1064_v37  ;;  %v984_v37 = vsub.f32 %v2534_v8, %v2278_v39 }
 0x19c   : > { %v1146_v44 = vadd.f32 %v1687_v50, %v1145_v22  ;;  %v1707_v10 = vpop.eup %1706  ;;  %1714 = vpow2.f32 %v1066_v31  ;;  %v2536_v31 = vld [vmem:[#allocation11_spill] sm:$0xff] }
 0x19d   : > { %v1709_v50 = vpop.eup %1708  ;;  %1716 = vpow2.f32 %v1068_v33 }
 0x19e   : > { %v1147_v49 = vadd.f32 %v1689_v54, %v1146_v44  ;;  %v1711_v44 = vpop.eup %1710  ;;  %v1072_v54 = vmul.f32 1.442695, %v972_v52  ;;  %1718 = vpow2.f32 %v1070_v16 }
 0x1a0   : > { %v1148_v45 = vadd.f32 %v1691_v47, %v1147_v49  ;;  %v1713_v28 = vpop.eup %1712  ;;  %v1074_v49 = vmul.f32 1.442695, %v973_v56  ;;  %1720 = vpow2.f32 %v1072_v54  ;;  %v1096_v56 = vmul.f32 1.442695, %v984_v37 }
 0x1a2   : > { %v1149_v62 = vadd.f32 %v1693_v34, %v1148_v45  ;;  %v1715_v29 = vpop.eup %1714  ;;  %1722 = vpow2.f32 %v1074_v49 }
 0x1a3   : > { %v1717_v34 = vpop.eup %1716  ;;  %1724 = vpow2.f32 %v1076_v58 }
 0x1a4   : > { %v1150_v55 = vadd.f32 %v1695_v53, %v1149_v62  ;;  %v1719_v62 = vpop.eup %1718  ;;  %v1080_v53 = vmul.f32 1.442695, %v976_v7  ;;  %1726 = vpow2.f32 %v1078_v35 }
 0x1a6   : > { %v1151_v30 = vadd.f32 %v1697_v40, %v1150_v55  ;;  %v1721_v11 = vpop.eup %1720  ;;  %v1082_v55 = vmul.f32 1.442695, %v977_v13  ;;  %1728 = vpow2.f32 %v1080_v53  ;;  %v2542_v13 = vld [vmem:[#allocation16_spill] sm:$0xff]  ;;  %v2543_v53 = vld [vmem:[#allocation17_spill] sm:$0xff] }
 0x1a7   : > { %v990_v35 = vsub.f32 %v2542_v13, %v2278_v39 }
 0x1a8   : > { %v1152_v6 = vadd.f32 %v1699_v59, %v1151_v30  ;;  %v1723_v17 = vpop.eup %1722  ;;  %1730 = vpow2.f32 %v1082_v55  ;;  %v1086_v59 = vmul.f32 1.442695, %v979_v26 }
 0x1a9   : > { %v1725_v30 = vpop.eup %1724  ;;  %1732 = vpow2.f32 %v1084_v32  ;;  %v1108_v32 = vmul.f32 1.442695, %v990_v35 }
 0x1aa   : > { %v1153_v14 = vadd.f32 %v1701_v36, %v1152_v6  ;;  %v1727_v9 = vpop.eup %1726  ;;  %v1088_v6 = vmul.f32 1.442695, %v2532_v38  ;;  %1734 = vpow2.f32 %v1086_v59  ;;  %v2545_v59 = vld [vmem:[#allocation19_spill] sm:$0xff] }
 0x1ac   : > { %v1154_v4 = vadd.f32 %v1703_v25, %v1153_v14  ;;  %v1729_v2 = vpop.eup %1728  ;;  %1736 = vpow2.f32 %v1088_v6 }
 0x1ad   : > { %1738 = vpow2.f32 %v1090_v63 }
 0x1ae   : > { %v1155_v46 = vadd.f32 %v1705_v15, %v1154_v4  ;;  %v1731_v25 = vpop.eup %1730  ;;  %v2535_v4 = vsub.f32 %v2251_v0, %v2278_v39 }
 0x1af   : > { %v1733_v42 = vpop.eup %1732 }
 0x1b0   : > { %v1156_v22 = vadd.f32 %v1707_v10, %v1155_v46  ;;  %v1092_v15 = vmul.f32 1.442695, %v2535_v4  ;;  %v985_v46 = vsub.f32 %v2536_v31, %v2278_v39  ;;  %v1094_v10 = vmul.f32 1.442695, %v2537_v43  ;;  %v1735_v33 = vpop.eup %1734 }
 0x1b2   : > { %v1157_v61 = vadd.f32 %v1709_v50, %v1156_v22  ;;  %v2538_v22 = vld [vmem:[#allocation12_spill] sm:$0xff]  ;;  %1740 = vpow2.f32 %v1092_v15  ;;  %v1737_v0 = vpop.eup %1736  ;;  %v1098_v60 = vmul.f32 1.442695, %v985_v46 }
 0x1b3   : > { %v986_v50 = vsub.f32 %v2538_v22, %v2278_v39  ;;  %1742 = vpow2.f32 %v1094_v10 }
 0x1b4   : > { %v1158_v23 = vadd.f32 %v1711_v44, %v1157_v61  ;;  %v2539_v61 = vld [vmem:[#allocation13_spill] sm:$0xff]  ;;  %1744 = vpow2.f32 %v1096_v56  ;;  %v2549_v56 = vsub.f32 %v2241_v24, %v2278_v39 }
 0x1b5   : > { %v987_v44 = vsub.f32 %v2539_v61, %v2278_v39  ;;  %v1100_v1 = vmul.f32 1.442695, %v986_v50  ;;  %1746 = vpow2.f32 %v1098_v60 }
 0x1b6   : > { %v1159_v47 = vadd.f32 %v1713_v28, %v1158_v23  ;;  %v1739_v23 = vpop.eup %1738  ;;  %v2540_v28 = vld [vmem:[#allocation14_spill] sm:$0xff] }
 0x1b7   : > { %v988_v57 = vsub.f32 %v2540_v28, %v2278_v39  ;;  %v1102_v58 = vmul.f32 1.442695, %v987_v44  ;;  %1748 = vpow2.f32 %v1100_v1  ;;  %v2550_v44 = vsub.f32 %v2257_v18, %v2278_v39 }
 0x1b8   : > { %v1160_v45 = vadd.f32 %v1715_v29, %v1159_v47  ;;  %v1741_v47 = vpop.eup %1740  ;;  %v2541_v29 = vld [vmem:[#allocation15_spill] sm:$0xff] }
 0x1b9   : > { %v989_v7 = vsub.f32 %v2541_v29, %v2278_v39  ;;  %1750 = vpow2.f32 %v1102_v58  ;;  %v1124_v60 = vmul.f32 1.442695, %v2550_v44 }
 0x1ba   : > { %v1161_v51 = vadd.f32 %v1717_v34, %v1160_v45  ;;  %v1743_v34 = vpop.eup %1742 }
 0x1bb   : > { %v1745_v20 = vpop.eup %1744 }
 0x1bc   : > { %v1162_v41 = vadd.f32 %v1719_v62, %v1161_v51  ;;  %v1104_v51 = vmul.f32 1.442695, %v988_v57  ;;  %v1747_v55 = vpop.eup %1746 }
 0x1be   : > { %v1163_v40 = vadd.f32 %v1721_v11, %v1162_v41  ;;  %v991_v41 = vsub.f32 %v2543_v53, %v2278_v39  ;;  %v1106_v11 = vmul.f32 1.442695, %v989_v7  ;;  %1752 = vpow2.f32 %v1104_v51 }
 0x1c0   : > { %v1164_v3 = vadd.f32 %v1723_v17, %v1163_v40  ;;  %v2544_v40 = vld [vmem:[#allocation18_spill] sm:$0xff]  ;;  %1754 = vpow2.f32 %v1106_v11 }
 0x1c1   : > { %v992_v17 = vsub.f32 %v2544_v40, %v2278_v39  ;;  %1756 = vpow2.f32 %v1108_v32 }
 0x1c2   : > { %v1165_v12 = vadd.f32 %v1725_v30, %v1164_v3  ;;  %v1749_v30 = vpop.eup %1748 }
 0x1c3   : > { %v1751_v6 = vpop.eup %1750  ;;  %v1112_v5 = vmul.f32 1.442695, %v992_v17 }
 0x1c4   : > { %v1166_v36 = vadd.f32 %v1727_v9, %v1165_v12  ;;  %v993_v12 = vsub.f32 %v2545_v59, %v2278_v39  ;;  %v1110_v9 = vmul.f32 1.442695, %v991_v41  ;;  %v931_v41 = vld [vmem:[#allocation3] sm:$0x1] }
 0x1c6   : > { %v1167_v14 = vadd.f32 %v1729_v2, %v1166_v36  ;;  %v2546_v36 = vld [vmem:[#allocation20_spill] sm:$0xff]  ;;  %1758 = vpow2.f32 %v1110_v9  ;;  %v1114_v37 = vmul.f32 1.442695, %v993_v12 }
 0x1c7   : > { %v994_v2 = vsub.f32 %v2546_v36, %v2278_v39  ;;  %1760 = vpow2.f32 %v1112_v5 }
 0x1c8   : > { %v1168_v48 = vadd.f32 %v1731_v25, %v1167_v14  ;;  %v1753_v14 = vpop.eup %1752  ;;  %v2547_v25 = vld [vmem:[#allocation21_spill] sm:$0xff]  ;;  %1762 = vpow2.f32 %v1114_v37 }
 0x1c9   : > { %v995_v8 = vsub.f32 %v2547_v25, %v2278_v39  ;;  %v1755_v15 = vpop.eup %1754 }
 0x1ca   : > { %v1169_v52 = vadd.f32 %v1733_v42, %v1168_v48  ;;  %v1116_v48 = vmul.f32 1.442695, %v994_v2  ;;  %v1757_v31 = vpop.eup %1756 }
 0x1cb   : > { %v1118_v46 = vmul.f32 1.442695, %v995_v8 }
 0x1cc   : > { %v1170_v16 = vadd.f32 %v1735_v33, %v1169_v52  ;;  %v1759_v10 = vpop.eup %1758  ;;  %1764 = vpow2.f32 %v1116_v48  ;;  %v2548_v52 = vsub.f32 %v2218_v19, %v2278_v39  ;;  %v2551_v19 = vsub.f32 %v2266_v21, %v2278_v39 }
 0x1cd   : > { %v1761_v50 = vpop.eup %1760  ;;  %1766 = vpow2.f32 %v1118_v46 }
 0x1ce   : > { %v1171_v54 = vadd.f32 %v1737_v0, %v1170_v16  ;;  %v1120_v33 = vmul.f32 1.442695, %v2548_v52  ;;  %v1122_v16 = vmul.f32 1.442695, %v2549_v56  ;;  %v1763_v61 = vpop.eup %1762  ;;  %v1126_v28 = vmul.f32 1.442695, %v2551_v19 }
 0x1d0   : > { %v1172_v49 = vadd.f32 %v1739_v23, %v1171_v54  ;;  %1768 = vpow2.f32 %v1120_v33 }
 0x1d1   : > { %1770 = vpow2.f32 %v1122_v16 }
 0x1d2   : > { %v1173_v45 = vadd.f32 %v1741_v47, %v1172_v49  ;;  %v1765_v23 = vpop.eup %1764  ;;  %1772 = vpow2.f32 %v1124_v60 }
 0x1d3   : > { %v1767_v1 = vpop.eup %1766  ;;  %1774 = vpow2.f32 %v1126_v28 }
 0x1d4   : > { %v1174_v62 = vadd.f32 %v1743_v34, %v1173_v45  ;;  %v2552_v34 = vld [vmem:[#allocation22_spill] sm:$0xff] }
 0x1d5   : > { %v2553_v13 = vsub.f32 %v2269_v27, %v2552_v34 }
 0x1d6   : > { %v1175_v26 = vadd.f32 %v1745_v20, %v1174_v62  ;;  %v1769_v24 = vpop.eup %1768 }
 0x1d7   : > { %v1771_v29 = vpop.eup %1770  ;;  %v929_v35 = vmul.f32 1.442695, %v2553_v13 }
 0x1d8   : > { %v1176_v3 = vadd.f32 %v1747_v55, %v1175_v26  ;;  %v1773_v58 = vpop.eup %1772 }
 0x1d9   : > { %v1775_v18 = vpop.eup %1774  ;;  %1776 = vpow2.f32 %v929_v35 }
 0x1da   : > { %v1177_v38 = vadd.f32 %v1749_v30, %v1176_v3 }
 0x1dc   : > { %v1178_v63 = vadd.f32 %v1751_v6, %v1177_v38 }
 0x1de   : > { %v1179_v4 = vadd.f32 %v1753_v14, %v1178_v63 }
 0x1df   : > { %v1777_v53 = vpop.eup %1776 }
 0x1e0   : > { %v1180_v42 = vadd.f32 %v1755_v15, %v1179_v4  ;;  %v932_v26 = vmul.f32 %v1777_v53, %v931_v41 }
 0x1e2   : > { %v1181_v43 = vadd.f32 %v1757_v31, %v1180_v42 }
 0x1e4   : > { %v1182_v22 = vadd.f32 %v1759_v10, %v1181_v43 }
 0x1e6   : > { %v1183_v0 = vadd.f32 %v1761_v50, %v1182_v22 }
 0x1e8   : > { %v1184_v54 = vadd.f32 %v1763_v61, %v1183_v0 }
 0x1ea   : > { %v1185_v57 = vadd.f32 %v1765_v23, %v1184_v54 }
 0x1ec   : > { %v1186_v49 = vadd.f32 %v1767_v1, %v1185_v57 }
 0x1ee   : > { %v1187_v47 = vadd.f32 %v1769_v24, %v1186_v49 }
 0x1f0   : > { %v1188_v7 = vadd.f32 %v1771_v29, %v1187_v47 }
 0x1f2   : > { %v1189_v45 = vadd.f32 %v1773_v58, %v1188_v7 }
 0x1f4   : > { %v1190_v51 = vadd.f32 %v1775_v18, %v1189_v45 }
 0x1f6   : > { %v1191_v62 = vrot.slane %v1190_v51, 4 }
 0x1f8   : > { %v1192_v21 = vadd.f32 %v1191_v62, %v1190_v51 }
 0x1fa   : > { %v1193_v39 = vrot.slane %v1192_v21, 2 }
 0x1fc   : > { %v1194_v20 = vadd.f32 %v1193_v39, %v1192_v21 }
 0x1fe   : > { %v1195_v11 = vrot.slane %v1194_v20, 1 }
 0x200   : > { %v1196_v55 = vadd.f32 %v1195_v11, %v1194_v20  ;;  %1203 = sbr.rel (%p1524_p4) target bundleno = 550 (0x226), region = 85 }
 0x202   : > { %v1197_v40 = vadd.f32 %v1196_v55, %v932_v26 }
 0x204   : > { %1198 = vst [vmem:[#allocation3] sm:$0x1] %v1197_v40 }
 0x205   : > { %v1204_v17 = vld [vmem:[#allocation2] sm:$0x1] }
 0x206   : > { %v1205_v27 = vld [vmem:[%s324_s11] sm:$0x1] }
 0x207   : > { %v1206_v32 = vld [vmem:[%s327_s0] sm:$0x1]  ;;  %v1211_v30 = vsub.f32 %v1205_v27, %v1204_v17 }
 0x208   : > { %v1207_v3 = vsub.f32 %v1206_v32, %v1204_v17 }
 0x209   : > { %v1212_v59 = vmul.f32 1.442695, %v1211_v30 }
 0x20a   : > { %v1208_v12 = vmul.f32 1.442695, %v1207_v3 }
 0x20b   : > { %1778 = vpow2.f32 %v1212_v59  ;;  %v1210_v9 = vld [vmem:[#allocation3] sm:$0x1] }
 0x20c   : > { %1780 = vpow2.f32 %v1208_v12 }
 0x211   : > { %v1779_v38 = vpop.eup %1778 }
 0x212   : > { %v1214_v6 = vsub.f32 %v1210_v9, %v1779_v38  ;;  %v1781_v36 = vpop.eup %1780 }
 0x214   : > { %v1215_v2 = vmax.f32 %v1214_v6, 0.0 }
 0x216   : > { %v1216_v5 = vadd.f32 %v1781_v36, %v1215_v2 }
 0x218   : > { %1782 = vlog2.f32 %v1216_v5 }
 0x21e   : > { %v1783_v63 = vpop.eup %1782 }
 0x21f   : > { %v1218_v14 = vmul.f32 0.6931472, %v1783_v63 }
 0x221   : > { %v1219_v25 = vadd.f32 %v1218_v14, %v1204_v17 }
 0x223   : > { %v1220_v8 = vsub.f32 %v1219_v25, %v1206_v32 }
 0x225   : > { %1221 = vst [vmem:[%s315_s25] sm:$0x1] %v1220_v8 }
 0x226 PF: > { %s1231_s27 = scalar_lea.hbm %s2497_s4, %s1866_s19  ;;  %s1233_s5 = sshll.u32 %s315_s25, 4  ;;  %s1234_s5 = int_to_ptr.vmem [resolvable:$true] %s1233_s5 }
 0x227   : > { %s1235_s7 = sshll.u32 %s1231_s27, 4  ;;  %s1223_s8 = scalar_lea.sflag [#allocation6], %s1990_s14  ;;  %s1236_s7 = int_to_ptr.hbm [resolvable:$true] %s1235_s7 }
 0x228   : > { %s1798_s9 = sshra.s32 %s1236_s7, 4  ;;  %s1804_s13 = scalar_lea.hbm %s2497_s4, 2  ;;  %s1799_s9 = int_to_ptr.hbm [resolvable:$true] %s1798_s9 }
 0x229   : > { %s1800_s10 = scalar_lea.hbm %s1799_s9, 1  ;;  %p1805_p10 = scmp.lt.s32.totalorder %s1799_s9, %s2497_s4 }
 0x22a   : > { %p1801_p5 = scmp.ne.s32.totalorder %s1799_s9, %s1800_s10  ;;  %p1806_p11 = scmp.lt.s32.totalorder %s1804_s13, %s1800_s10 }
 0x22c   : > { %p1802_p6 = pnand %p1801_p5, %p1963_p7  ;;  %p1807_p12 = por %p1806_p11, %p1805_p10 }
 0x22e   : > { %p1803_p8 = pneg %p1802_p6 }
 0x230   : > { %p1808_p13 = pnand %p1807_p12, %p1803_p8 }
 0x232   : > { %1811 = shalt.err (!%p1808_p13)
}
 0x233   : > { %1575 = dma.vmem_to_hbm [thread:$0]  (%p1963_p7), %s1234_s5, 16, %s1236_s7, %s1223_s8  }
 0x234 PF: > { %p1581_p0 = scmp.ge.s32.totalorder %s1878_s22, 2  ;;  %s1247_s19 = sand.u32 1, %s1850_s15  }
 0x235   : > { %s1248_s25 = scalar_lea.sflag [#allocation6], %s1247_s19 }
 0x236   : > { %p1578_p1 = pnand %p1581_p0, %p1969_p9 }
 0x238   : > { %p1579_p2 = pneg %p1578_p1 }
 0x23a   : > { %1845 = dma.done.wait (%p1579_p2), %s1248_s25, 16  }
 0x23b   : > { %1847 = vsyncadd (%p1579_p2), %s1248_s25, 4294967280  ;;  %s17_s22 = sadd.s32 1, %s1878_s22   ;;  %s2554_s28 = sld [smem:[#allocation8_spill]] }
 0x23c   : > { %p14_p3 = scmp.ge.s32.totalorder %s17_s22, 6   ;;  %s2555_s14 = sld [smem:[#allocation9_spill]] }
 0x23d   : > { %s2556_s15 = smov %s1854_s16  ;;  %s2557_s16 = smov %s1858_s17 }
 0x23e   : > { %s2558_s17 = smov %s1977_s6  ;;  %s2559_s18 = smov %s1870_s20 }
 0x23f   : > { %s2560_s19 = smov %s1874_s21  ;;  %16 = sbr.rel (!%p14_p3) target bundleno = 7 (0x7), region = 134 }
 0x241   : > { %s2561_s20 = smov %s2554_s28 }
 0x242   : > { %s2562_s21 = smov %s2555_s14 }
 0x244   :  { %1253 = vsyncpa [#allocation6], 1 }
 0x245   :  { %1255 = vsyncpa [#allocation6 + $0x1], 1 }

</bundles_post_ra>
